<compile_context>
chip_gen: v7x
topology: tpu7x:2x2x1
jax: 0.10.0
libtpu: 0.0.40
codegen_flags: <defaults>
</compile_context>

<pallas_src>
import jax
import jax.numpy as jnp
from jax.experimental import pallas as pl
from jax.experimental.pallas import tpu as pltpu


def _complex_to_interleaved_f32(x):
    """complex64 [..., D] -> float32 [..., 2*D] (re/im interleaved)."""
    try:
        # Free reinterpretation (no extra HBM pass) when the backend allows
        # width-changing bitcasts of complex types.
        f = jax.lax.bitcast_convert_type(x, jnp.float32)      # [..., D, 2]
    except Exception:
        # TODO(synk): complex bitcast unsupported here; fallback costs one extra
        # fused HBM pass per input (still 2 kernel streams instead of 4).
        f = jnp.stack([jnp.real(x), jnp.imag(x)], axis=-1)    # [..., D, 2]
    return f.reshape(*x.shape[:-1], 2 * x.shape[-1])


def _pick_tile_rows(n_rows, n_lanes):
    """Largest pipeline-friendly row tile; keeps 2 streams x 2 buffers <= ~16 MiB."""
    lane_padded = ((n_lanes + 127) // 128) * 128
    max_rows = max(8, (4 * 1024 * 1024) // (4 * lane_padded))
    if n_rows <= max_rows:
        return n_rows                    # single tile == full row extent (legal)
    return (max_rows // 8) * 8           # multiple of 8 sublanes


def _make_kernel(n_rows, tile_rows, relax, min_dist, mse_denom, inv_denom):
    relax = float(relax)
    inv_const = 1.0 / (float(min_dist) + relax)
    mse_scale = 1.0 / float(mse_denom)
    inv_scale = 1.0 / float(inv_denom)
    needs_mask = (n_rows % tile_rows) != 0

    def kernel(p_ref, t_ref, out_ref, acc_ref):
        i = pl.program_id(0)

        @pl.when(i == 0)
        def _init():
            acc_ref[0] = jnp.float32(0.0)
            acc_ref[1] = jnp.float32(0.0)

        p = p_ref[...]                                   # [tile_rows, 2D] f32
        t = t_ref[...]

        if needs_mask:
            row = i * tile_rows + jax.lax.broadcasted_iota(
                jnp.int32, (tile_rows, 1), 0)
            valid = row < n_rows                         # [tile_rows, 1] bool
            p = jnp.where(valid, p, 0.0)
            t = jnp.where(valid, t, 0.0)

        # --- mse branch: total sum of squared component differences --------
        d = p - t
        mse_part = jnp.sum(d * d)

        # --- inverse_norm branch: per-row complex 2-norm over last dim -----
        pnorm = jnp.sqrt(jnp.sum(p * p, axis=-1, keepdims=True))  # [tile_rows, 1]
        inv = jnp.maximum(pl.reciprocal(pnorm + relax) - inv_const, 0.0)
        if needs_mask:
            inv = jnp.where(valid, inv, 0.0)
        inv_part = jnp.sum(inv)

        acc_ref[0] += mse_part
        acc_ref[1] += inv_part

        @pl.when(i == pl.num_programs(0) - 1)
        def _finalize():
            out_ref[0] = acc_ref[0] * mse_scale
            out_ref[1] = acc_ref[1] * inv_scale

    return kernel


def complex_mse_with_inverse_norm(predicts, targets, relax=0.25, min_dist=1.0,
                                  *, tile_rows=None):
    """predicts, targets: complex arrays of shape [B, N, D]."""
    assert predicts.shape == targets.shape and predicts.ndim == 3
    B, N, D = predicts.shape
    R, L = B * N, 2 * D

    p2 = _complex_to_interleaved_f32(predicts).reshape(R, L)
    t2 = _complex_to_interleaved_f32(targets).reshape(R, L)

    trows = _pick_tile_rows(R, L) if tile_rows is None else min(int(tile_rows), R)
    if trows < R and trows % 8 != 0:
        trows = max(8, (trows // 8) * 8)
    grid = (pl.cdiv(R, trows),)

    kernel = _make_kernel(R, trows, relax, min_dist,
                          mse_denom=B * D, inv_denom=B * N)

    row_spec = pl.BlockSpec((trows, L), lambda i: (i, 0))

    # TODO(synk): on v7x a leading size-2 "parallel" grid axis (one half of the
    # rows per TensorCore, per-core partial sums summed in the wrapper) would
    # add up to ~2x; omitted to keep one code path correct on v5e/v6e/v7x.
    out = pl.pallas_call(
        kernel,
        grid=grid,
        in_specs=[row_spec, row_spec],
        out_specs=pl.BlockSpec(memory_space=pltpu.MemorySpace.SMEM),
        out_shape=jax.ShapeDtypeStruct((2,), jnp.float32),
        scratch_shapes=[pltpu.SMEM((2,), jnp.float32)],
        compiler_params=pltpu.CompilerParams(
            dimension_semantics=("arbitrary",),
            vmem_limit_bytes=32 * 1024 * 1024,
        ),
    )(p2, t2)

    return {"mse": out[0], "inverse_norm": out[1]}


def _reference(predicts, targets, relax=0.25, min_dist=1.0):
    diffs = predicts - targets
    sq = jnp.real(diffs) ** 2 + jnp.imag(diffs) ** 2
    mse = jnp.mean(jnp.sum(sq, axis=1))
    pnorm = jnp.sqrt(jnp.sum(jnp.abs(predicts) ** 2, axis=-1))
    inv = jnp.maximum(1.0 / (pnorm + relax) - 1.0 / (min_dist + relax), 0.0)
    return {"mse": mse, "inverse_norm": jnp.mean(inv)}


def _make_inputs(key, B, N, D):
    k1, k2, k3, k4 = jax.random.split(key, 4)
    predicts = (jax.random.normal(k1, (B, N, D), jnp.float32)
                + 1j * jax.random.normal(k2, (B, N, D), jnp.float32))
    targets = (jax.random.normal(k3, (B, N, D), jnp.float32)
               + 1j * jax.random.normal(k4, (B, N, D), jnp.float32))
    return predicts.astype(jnp.complex64), targets.astype(jnp.complex64)


if __name__ == "__main__":
    # Test 1: small shape, single tile.
    predicts, targets = _make_inputs(jax.random.PRNGKey(0), 2, 8, 16)
    out = complex_mse_with_inverse_norm(predicts, targets, relax=0.25, min_dist=1.0)
    out = jax.block_until_ready(out)
    ref = _reference(predicts, targets, relax=0.25, min_dist=1.0)
    assert jnp.allclose(out["mse"], ref["mse"], rtol=1e-5, atol=1e-5)
    assert jnp.allclose(out["inverse_norm"], ref["inverse_norm"], rtol=1e-5, atol=1e-5)

    # Test 2: row count (B*N=15) not a multiple of the forced tile (8) ->
    # exercises multi-step accumulation and remainder-row masking.
    predicts2, targets2 = _make_inputs(jax.random.PRNGKey(1), 3, 5, 16)
    out2 = complex_mse_with_inverse_norm(predicts2, targets2, relax=0.25,
                                         min_dist=1.0, tile_rows=8)
    out2 = jax.block_until_ready(out2)
    ref2 = _reference(predicts2, targets2, relax=0.25, min_dist=1.0)
    assert jnp.allclose(out2["mse"], ref2["mse"], rtol=1e-5, atol=1e-5)
    assert jnp.allclose(out2["inverse_norm"], ref2["inverse_norm"], rtol=1e-5, atol=1e-5)

    print("KERNEL_OK")
</pallas_src>

<mosaic_0001>
module attributes {stable_mosaic.version = 11 : i64} {
  func.func @kernel(%arg0: i32, %arg1: memref<16x32xf32, #tpu.memory_space<vmem>>, %arg2: memref<16x32xf32, #tpu.memory_space<vmem>>, %arg3: memref<2xf32, #tpu.memory_space<smem>>, %arg4: memref<2xf32, #tpu.memory_space<smem>>) attributes {dimension_semantics = [#tpu.dimension_semantics<arbitrary>], iteration_bounds = array<i64: 1>, scalar_prefetch = 0 : i64, scratch_operands = 1 : i64, tpu.core_type = #tpu.core_type<tc>, window_params = [{transform_indices = @transform_0, window_bounds = array<i64: 16, 32>}, {transform_indices = @transform_1, window_bounds = array<i64: 16, 32>}, {transform_indices = @transform_2, window_bounds = array<i64: 2>}]} {
    %c0_i32 = arith.constant 0 : i32
    %0 = arith.cmpi eq, %arg0, %c0_i32 : i32
    %1 = arith.extui %0 : i1 to i32
    %c0_i32_0 = arith.constant 0 : i32
    %2 = arith.cmpi ne, %1, %c0_i32_0 : i32
    scf.if %2 {
      %cst_14 = arith.constant 0.000000e+00 : f32
      %c0_15 = arith.constant 0 : index
      %35 = memref.load %arg4[%c0_15] : memref<2xf32, #tpu.memory_space<smem>>
      memref.store %cst_14, %arg4[%c0_15] : memref<2xf32, #tpu.memory_space<smem>>
      %cst_16 = arith.constant 0.000000e+00 : f32
      %c1_17 = arith.constant 1 : index
      %36 = memref.load %arg4[%c1_17] : memref<2xf32, #tpu.memory_space<smem>>
      memref.store %cst_16, %arg4[%c1_17] : memref<2xf32, #tpu.memory_space<smem>>
    } else {
    }
    %c0 = arith.constant 0 : index
    %c0_1 = arith.constant 0 : index
    %3 = vector.load %arg1[%c0, %c0_1] : memref<16x32xf32, #tpu.memory_space<vmem>>, vector<16x32xf32>
    %c0_2 = arith.constant 0 : index
    %c0_3 = arith.constant 0 : index
    %4 = vector.load %arg2[%c0_2, %c0_3] : memref<16x32xf32, #tpu.memory_space<vmem>>, vector<16x32xf32>
    %5 = arith.subf %3, %4 : vector<16x32xf32>
    %6 = arith.mulf %5, %5 : vector<16x32xf32>
    %7 = vector.shape_cast %6 : vector<16x32xf32> to vector<1x16x32xf32>
    %cst = arith.constant dense<0.000000e+00> : vector<1xf32>
    %8 = vector.multi_reduction <add>, %7, %cst [1, 2] : vector<1x16x32xf32> to vector<1xf32>
    %9 = vector.shape_cast %8 : vector<1xf32> to vector<1x1x1xf32>
    %10 = vector.extract %9[0, 0, 0] : f32 from vector<1x1x1xf32>
    %11 = arith.mulf %3, %3 : vector<16x32xf32>
    %cst_4 = arith.constant dense<0.000000e+00> : vector<16xf32>
    %12 = vector.multi_reduction <add>, %11, %cst_4 [1] : vector<16x32xf32> to vector<16xf32>
    %13 = vector.shape_cast %12 : vector<16xf32> to vector<16x1xf32>
    %14 = math.sqrt %13 : vector<16x1xf32>
    %cst_5 = arith.constant 2.500000e-01 : f32
    %15 = vector.broadcast %cst_5 : f32 to vector<16x1xf32>
    %16 = arith.addf %14, %15 : vector<16x1xf32>
    %17 = tpu.reciprocal %16 : vector<16x1xf32> -> vector<16x1xf32>
    %cst_6 = arith.constant 8.000000e-01 : f32
    %18 = vector.broadcast %cst_6 : f32 to vector<16x1xf32>
    %19 = arith.subf %17, %18 : vector<16x1xf32>
    %cst_7 = arith.constant 0.000000e+00 : f32
    %20 = vector.broadcast %cst_7 : f32 to vector<16x1xf32>
    %21 = arith.maximumf %19, %20 : vector<16x1xf32>
    %22 = vector.shape_cast %21 : vector<16x1xf32> to vector<1x16x1xf32>
    %cst_8 = arith.constant dense<0.000000e+00> : vector<1xf32>
    %23 = vector.multi_reduction <add>, %22, %cst_8 [1, 2] : vector<1x16x1xf32> to vector<1xf32>
    %24 = vector.shape_cast %23 : vector<1xf32> to vector<1x1x1xf32>
    %25 = vector.extract %24[0, 0, 0] : f32 from vector<1x1x1xf32>
    %c0_9 = arith.constant 0 : index
    %26 = memref.load %arg4[%c0_9] : memref<2xf32, #tpu.memory_space<smem>>
    %27 = arith.addf %26, %10 : f32
    %c0_10 = arith.constant 0 : index
    %28 = memref.load %arg4[%c0_10] : memref<2xf32, #tpu.memory_space<smem>>
    memref.store %27, %arg4[%c0_10] : memref<2xf32, #tpu.memory_space<smem>>
    %c1 = arith.constant 1 : index
    %29 = memref.load %arg4[%c1] : memref<2xf32, #tpu.memory_space<smem>>
    %30 = arith.addf %29, %25 : f32
    %c1_11 = arith.constant 1 : index
    %31 = memref.load %arg4[%c1_11] : memref<2xf32, #tpu.memory_space<smem>>
    memref.store %30, %arg4[%c1_11] : memref<2xf32, #tpu.memory_space<smem>>
    %c0_i32_12 = arith.constant 0 : i32
    %32 = arith.cmpi eq, %arg0, %c0_i32_12 : i32
    %33 = arith.extui %32 : i1 to i32
    %c0_i32_13 = arith.constant 0 : i32
    %34 = arith.cmpi ne, %33, %c0_i32_13 : i32
    scf.if %34 {
      %c0_14 = arith.constant 0 : index
      %35 = memref.load %arg4[%c0_14] : memref<2xf32, #tpu.memory_space<smem>>
      %cst_15 = arith.constant 3.125000e-02 : f32
      %36 = arith.mulf %35, %cst_15 : f32
      %c0_16 = arith.constant 0 : index
      %37 = memref.load %arg3[%c0_16] : memref<2xf32, #tpu.memory_space<smem>>
      memref.store %36, %arg3[%c0_16] : memref<2xf32, #tpu.memory_space<smem>>
      %c1_17 = arith.constant 1 : index
      %38 = memref.load %arg4[%c1_17] : memref<2xf32, #tpu.memory_space<smem>>
      %cst_18 = arith.constant 6.250000e-02 : f32
      %39 = arith.mulf %38, %cst_18 : f32
      %c1_19 = arith.constant 1 : index
      %40 = memref.load %arg3[%c1_19] : memref<2xf32, #tpu.memory_space<smem>>
      memref.store %39, %arg3[%c1_19] : memref<2xf32, #tpu.memory_space<smem>>
    } else {
    }
    return
  }
  func.func @transform_0(%arg0: i32) -> (i32, i32) {
    %c0_i32 = arith.constant 0 : i32
    %c0_i32_0 = arith.constant 0 : i32
    return %arg0, %c0_i32 : i32, i32
  }
  func.func @transform_1(%arg0: i32) -> (i32, i32) {
    %c0_i32 = arith.constant 0 : i32
    %c0_i32_0 = arith.constant 0 : i32
    return %arg0, %c0_i32 : i32, i32
  }
  func.func @transform_2(%arg0: i32) -> i32 {
    %c0_i32 = arith.constant 0 : i32
    %c0_i32_0 = arith.constant 0 : i32
    return %c0_i32 : i32
  }
}

</mosaic_0001>

<bundles_post_ra>
// kernel: tpu_custom_call.1
= control target key start
LH: loop header
LB: loop body
LE: loop exit
PB: predicated region body
PF: predicated region fallthrough
CT: control target
= control target key end

     0   :  { %7 = vsyncpa [#allocation4], 0  ;;  %s283_s0 = inlined_call_operand.hbm [shape: f32[16,32], index: 0, kind: input, shape index: {}]   ;;  %s284_s1 = inlined_call_operand.hbm [shape: f32[16,32], index: 1, kind: input, shape index: {}]   ;;  %s285_s2 = inlined_call_operand.hbm [shape: f32[2], index: 2, kind: output, shape index: {}]  }
   0x1   :  { %8 = vsyncpa [#allocation7], 0 }
   0x2   :  { %9 = vsyncpa [#allocation5], 0  ;;  %s227_s9 = smov [#allocation3]   ;;  %s167_s13 = scalar_lea.hbm %s283_s0, 256 }
   0x3   :  { %s15_s10 = sshll.u32 %s227_s9, 4  ;;  %p168_p0 = scmp.ne.s32.totalorder %s283_s0, %s167_s13  ;;  %s16_s10 = int_to_ptr.vmem [resolvable:$true] %s15_s10 }
   0x4   :  { %p171_p1 = scmp.lt.u32.totalorder %s167_s13, %s283_s0 }
   0x6   :  { %p173_p2 = pnand %p171_p1, %p168_p0 }
   0x8   :  { %176 = shalt.err (!%p173_p2)
}
   0x9   :  { %s177_s18 = scalar_lea.vmem %s16_s10, 256  ;;  %p182_p4 = scmp.lt.s32.totalorder %s16_s10, %s16_s10 }
   0xa   :  { %p178_p3 = scmp.ne.s32.totalorder %s16_s10, %s177_s18  ;;  %p183_p5 = scmp.lt.s32.totalorder %s177_s18, %s177_s18 }
   0xc   :  { %p184_p6 = por %p183_p5, %p182_p4 }
   0xe   :  { %p185_p7 = pnand %p184_p6, %p178_p3 }
  0x10   :  { %188 = shalt.err (!%p185_p7)
}
  0x11   :  { %s228_s19 = smov 128   ;;  %s229_s20 = smov 8  }
  0x12   :  { %21 = dma.hbm_to_vmem [thread:$0]  %s283_s0, 256, %s16_s10, [#allocation4], %s228_s19, %s228_s19, %s229_s20  }
  0x13   :  { %s230_s23 = smov [#allocation6]   ;;  %s189_s27 = scalar_lea.hbm %s284_s1, 256 }
  0x14   :  { %s27_s24 = sshll.u32 %s230_s23, 4  ;;  %p190_p8 = scmp.ne.s32.totalorder %s284_s1, %s189_s27  ;;  %s28_s24 = int_to_ptr.vmem [resolvable:$true] %s27_s24 }
  0x15   :  { %p193_p9 = scmp.lt.u32.totalorder %s189_s27, %s284_s1 }
  0x17   :  { %p195_p10 = pnand %p193_p9, %p190_p8 }
  0x19   :  { %198 = shalt.err (!%p195_p10)
}
  0x1a   :  { %s199_s4 = scalar_lea.vmem %s28_s24, 256  ;;  %p204_p12 = scmp.lt.s32.totalorder %s28_s24, %s28_s24 }
  0x1b   :  { %p200_p11 = scmp.ne.s32.totalorder %s28_s24, %s199_s4  ;;  %p205_p13 = scmp.lt.s32.totalorder %s199_s4, %s199_s4 }
  0x1d   :  { %p206_p0 = por %p205_p13, %p204_p12 }
  0x1f   :  { %p207_p1 = pnand %p206_p0, %p200_p11 }
  0x21   :  { %210 = shalt.err (!%p207_p1)
}
  0x22   :  { %33 = dma.hbm_to_vmem [thread:$0]  %s284_s1, 256, %s28_s24, [#allocation7], %s228_s19, %s228_s19, %s229_s20  }
  0x23   :  { %221 = dma.done.wait [#allocation4], 256  }
  0x24   :  { %222 = vsyncadd [#allocation4], 4294967040 }
  0x25   :  { %223 = dma.done.wait [#allocation7], 256  }
  0x26   :  { %224 = vsyncadd [#allocation7], 4294967040  ;;  %v48_v0 = vld [vmem:[#allocation3] sm:$0xff]  ;;  %vm56_vm0 = vcmask 261120   ;;  %v49_v1 = vld [vmem:[#allocation3 + $0x8] sm:$0xff]  ;;  %vm99_vm5 = vcmask 7168  }
  0x27   :  { %v69_v2 = vmul.f32 %v48_v0, %v48_v0  ;;  %v70_v3 = vmul.f32 %v49_v1, %v49_v1  ;;  %v50_v6 = vld [vmem:[#allocation6] sm:$0xff]  ;;  %v51_v7 = vld [vmem:[#allocation6 + $0x8] sm:$0xff]  ;;  %s211_s11 = scalar_lea.hbm %s285_s2, 16 }
  0x28   :  { %v52_v8 = vsub.f32 %v48_v0, %v50_v6  ;;  %v53_v9 = vsub.f32 %v49_v1, %v51_v7  ;;  %p212_p2 = scmp.ne.s32.totalorder %s285_s2, %s211_s11  ;;  %p215_p3 = scmp.lt.u32.totalorder %s211_s11, %s285_s2 }
  0x29   :  { %v71_v4 = vsel %vm56_vm0, %v69_v2, 0.0  ;;  %v74_v5 = vsel %vm56_vm0, %v70_v3, 0.0 }
  0x2a   :  { %72 = vadd.xlane.f32.xlu0 %v71_v4  ;;  %v54_v10 = vmul.f32 %v52_v8, %v52_v8  ;;  %v55_v11 = vmul.f32 %v53_v9, %v53_v9  ;;  %p217_p4 = pnand %p215_p3, %p212_p2 }
  0x2c   :  { %v57_v12 = vsel %vm56_vm0, %v54_v10, 0.0  ;;  %v58_v13 = vsel %vm56_vm0, %v55_v11, 0.0 }
  0x2d   :  { %v59_v14 = vadd.f32 %v58_v13, %v57_v12 }
  0x2e   :  { %75 = vadd.xlane.f32.xlu0 %v74_v5 }
  0x2f   :  { %60 = vadd.xlane.f32.xlu1 %v59_v14 }
  0xb7   :  { %v73_v15 = vpop.xlane.xlu0 %72 }
  0xb8   :  { %159 = vrsqrt.f32 %v73_v15  ;;  %vm79_vm1 = vcmp.eq.f32.partialorder %v73_v15, inf  ;;  %v82_v19 = vand.u32 2147483648, %v73_v15  ;;  %vm81_vm2 = vcmp.eq.f32.partialorder %v73_v15, 0.0 }
  0xbb   :  { %v76_v16 = vpop.xlane.xlu0 %75 }
  0xbc   :  { %161 = vrsqrt.f32 %v76_v16  ;;  %vm86_vm3 = vcmp.eq.f32.partialorder %v76_v16, inf  ;;  %v89_v25 = vand.u32 2147483648, %v76_v16  ;;  %vm88_vm4 = vcmp.eq.f32.partialorder %v76_v16, 0.0  ;;  %v61_v38 = vpop.xlane.xlu1 %60 }
  0xbd   :  { %v62_v39 = vrot.slane %v61_v38, 4 }
  0xbf   :  { %v63_v40 = vadd.f32 %v62_v39, %v61_v38 }
  0xc1   :  { %v64_v41 = vrot.slane %v63_v40, 2 }
  0xc2   :  { %v160_v17 = vpop.eup %159 }
  0xc3   :  { %v78_v18 = vmul.f32 %v160_v17, %v73_v15  ;;  %v65_v42 = vadd.f32 %v64_v41, %v63_v40 }
  0xc5   :  { %v80_v20 = vsel %vm79_vm1, %v73_v15, %v78_v18  ;;  %v66_v43 = vrot.slane %v65_v42, 1 }
  0xc6   :  { %v162_v21 = vpop.eup %161  ;;  %v83_v22 = vsel %vm81_vm2, %v82_v19, %v80_v20 }
  0xc7   :  { %v85_v23 = vmul.f32 %v162_v21, %v76_v16  ;;  %v91_v24 = vadd.f32 0.25, %v83_v22  ;;  %v67_v44 = vadd.f32 %v66_v43, %v65_v42 }
  0xc9   :  { %v87_v26 = vsel %vm86_vm3, %v76_v16, %v85_v23  ;;  %163 = vrcp.f32 %v91_v24  ;;  %150 = vpush %v67_v44 }
  0xca   :  { %v90_v27 = vsel %vm88_vm4, %v89_v25, %v87_v26 }
  0xcb   :  { %v92_v28 = vadd.f32 0.25, %v90_v27 }
  0xcd   :  { %165 = vrcp.f32 %v92_v28 }
  0xd3   :  { %v164_v29 = vpop.eup %163 }
  0xd4   :  { %v146_v30 = vadd.f32 -0.8, %v164_v29 }
  0xd6   :  { %v97_v33 = vmax.f32 %v146_v30, 0.0 }
  0xd7   :  { %v166_v31 = vpop.eup %165 }
  0xd8   :  { %v147_v32 = vadd.f32 -0.8, %v166_v31  ;;  %v100_v35 = vsel %vm99_vm5, %v97_v33, 0.0 }
  0xda   :  { %v98_v34 = vmax.f32 %v147_v32, 0.0 }
  0xdc   :  { %v101_v36 = vsel %vm99_vm5, %v98_v34, 0.0 }
  0xdd   :  { %v102_v37 = vadd.f32 %v101_v36, %v100_v35 }
  0xdf   :  { %103 = vadd.xlane.f32.xlu1 %v102_v37 }
  0xfa   :  { %s151_s1 = spop %150 }
  0xfb   :  { %s124_s6 = smul.f32 0.03125, %s151_s1 }
  0xfd   :  { %126 = sst [smem:[#allocation8]] %s124_s6 }
 0x16c   :  { %v104_v45 = vpop.xlane.xlu1 %103 }
 0x16d   :  { %v105_v46 = vrot.slane %v104_v45, 4 }
 0x16f   :  { %v106_v47 = vadd.f32 %v105_v46, %v104_v45 }
 0x171   :  { %v107_v48 = vrot.slane %v106_v47, 2 }
 0x173   :  { %v108_v49 = vadd.f32 %v107_v48, %v106_v47 }
 0x175   :  { %v109_v50 = vrot.slane %v108_v49, 1 }
 0x177   :  { %v110_v51 = vadd.f32 %v109_v50, %v108_v49 }
 0x179   :  { %152 = vpush %v110_v51 }
 0x1aa   :  { %s153_s7 = spop %152 }
 0x1ab   :  { %s128_s8 = smul.f32 0.0625, %s153_s7 }
 0x1ad   :  { %130 = sst [smem:[#allocation8 + $0x1]] %s128_s8 }
 0x1ae   :  { %220 = shalt.err (!%p217_p4)
}
 0x1af   :  { %s231_s16 = smov [#allocation8]  }
 0x1b0   :  { %138 = dma.smem_to_hbm %s231_s16, 16, %s285_s2, [#allocation5]  }
 0x1b1   :  { %225 = dma.done.wait [#allocation5], 16  }
 0x1b2   :  { %226 = vsyncadd [#allocation5], 4294967280 }
 0x1b3   :  { %142 = sfence }
 0x1b4   :  { %143 = vsyncpa [#allocation4], 1 }
 0x1b5   :  { %144 = vsyncpa [#allocation7], 1 }
 0x1b6   :  { %145 = vsyncpa [#allocation5], 1 }

</bundles_post_ra>
